<compile_context>
chip_gen: v7x
topology: tpu7x:2x2x1
jax: 0.10.0
libtpu: 0.0.40
codegen_flags: <defaults>
</compile_context>

<pallas_src>
import functools

import jax
import jax.numpy as jnp
from jax.experimental import pallas as pl
from jax.experimental.pallas import tpu as pltpu


def _passthrough_copy_kernel(x_ref, o_ref):
    # Identity body — a concrete subclass would replace this with real compute.
    o_ref[...] = x_ref[...]


def _chip_budgets():
    """(max_block_bytes, vmem_limit_bytes) chosen per TPU generation."""
    vmem_bytes = None
    try:
        info = pltpu.get_tpu_info()
        vmem_bytes = getattr(info, "vmem_capacity_bytes", None)
    except Exception:
        vmem_bytes = None
    if vmem_bytes is None:
        vmem_bytes = 64 * 1024 * 1024  # assume the tightest (v7x-class) VMEM
    if vmem_bytes >= 96 * 1024 * 1024:
        # v5e / v6e: 128 MiB physical VMEM — bigger blocks amortize the
        # ~0.35 us per-grid-step overhead; 4x8 MiB double-buffered = 32 MiB.
        return 8 * 1024 * 1024, 64 * 1024 * 1024
    # v7x: 64 MiB physical VMEM — 4 MiB blocks, double-buffered in+out = 16 MiB,
    # still inside a 32 MiB scoped limit.
    return 4 * 1024 * 1024, 32 * 1024 * 1024


def _sublane_floor(dtype) -> int:
    # Sub-32-bit dtypes pack along sublanes (bf16 vreg = [16,128], int8 =
    # [32,128]); keep block rows a multiple of the packed height so stores
    # stay full, unmasked vst.
    itemsize = jnp.dtype(dtype).itemsize
    return max(8, 32 // max(itemsize, 1))


def _choose_lane_width(total_elems: int):
    # Largest lane-dense (multiple-of-128) last dim that evenly divides the
    # flattened array, so every store is a full unmasked vst.
    for lanes in (1024, 512, 256, 128):
        if total_elems % lanes == 0:
            return lanes
    return None


def _choose_block_rows(rows: int, row_bytes: int, dtype, max_block_bytes: int) -> int:
    floor = _sublane_floor(dtype)
    if rows <= floor:
        return rows  # single whole-rows block (block dims == full array dims)
    budget_rows = max(floor, max_block_bytes // max(row_bytes, 1))
    block_rows = min(rows, budget_rows)
    block_rows = max(floor, (block_rows // floor) * floor)
    # Keep >= 4 grid steps when there is enough work so v7x's two TensorCores
    # each get >= 2 pipelined steps (neutral on single-TC v5e/v6e).
    if rows >= 4 * floor:
        cap = max(floor, (rows // 4 // floor) * floor)
        block_rows = min(block_rows, cap)
    return block_rows


def _tiled_copy_2d(x2d: jax.Array, *, alias_input: bool) -> jax.Array:
    rows, cols = x2d.shape
    max_block_bytes, vmem_limit = _chip_budgets()
    row_bytes = cols * x2d.dtype.itemsize
    block_rows = _choose_block_rows(rows, row_bytes, x2d.dtype, max_block_bytes)
    # cdiv grid: the final partial block (if any) is masked by Pallas — no
    # divisibility requirement, so awkward row counts keep the large block.
    grid = (pl.cdiv(rows, block_rows),)

    return pl.pallas_call(
        _passthrough_copy_kernel,
        out_shape=jax.ShapeDtypeStruct((rows, cols), x2d.dtype),
        grid=grid,
        in_specs=[pl.BlockSpec((block_rows, cols), lambda i: (i, 0))],
        out_specs=pl.BlockSpec((block_rows, cols), lambda i: (i, 0)),
        # Default Buffered(2) is already ideal for a pure HBM-bound copy: the
        # block-i writeback overlaps the block-(i+1) read.  Do not deepen it.
        compiler_params=pltpu.CompilerParams(
            # "parallel" shards the row axis across the 2 TensorCores on v7x;
            # neutral on single-TC v5e/v6e.
            dimension_semantics=("parallel",),
            vmem_limit_bytes=vmem_limit,
        ),
        cost_estimate=pl.CostEstimate(
            flops=0,
            transcendentals=0,
            bytes_accessed=2 * x2d.size * x2d.dtype.itemsize,
        ),
        # With jit donation on the caller side this avoids allocating/writing a
        # second HBM buffer for a pure identity.
        input_output_aliases={0: 0} if alias_input else {},
    )(x2d)


def _pallas_identity_copy(x: jax.Array, *, alias_input: bool = False) -> jax.Array:
    """Tiled lane-dense VMEM copy — the kernel template a subclass would own."""
    if x.ndim == 0 or x.size == 0:
        return x  # nothing worth launching a kernel for
    lanes = _choose_lane_width(x.size)
    if lanes is not None:
        rows = x.size // lanes
        # Flatten in the wrapper (free layout plumbing) so the kernel sees a
        # lane-dense 2D slab and the grid gives real double-buffered pipelining.
        y2d = _tiled_copy_2d(x.reshape(rows, lanes), alias_input=alias_input)
        return y2d.reshape(x.shape)
    # Fallback for element counts not divisible by 128: keep the trailing dim
    # whole (a full last dim satisfies the (8,128) rule) and tile the leading
    # dims, so VMEM use stays bounded and the copy stays pipelined.
    cols = x.shape[-1] if x.ndim >= 2 else x.size
    rows = x.size // cols
    y2d = _tiled_copy_2d(x.reshape(rows, cols), alias_input=alias_input)
    return y2d.reshape(x.shape)


def base_network_forward(
    x: jax.Array, *, force_pallas: bool = False, alias_input: bool = False
) -> jax.Array:
    """Pallas/JAX equivalent of BaseNetwork.forward.

    PyTorch's BaseNetwork.forward raises NotImplementedError; the only
    parameter-free semantics of the base class is identity.  The fastest
    identity moves zero bytes, so by default we simply return x (no HBM
    read/write, no kernel launch).  `force_pallas=True` routes through the
    tiled Pallas copy kernel (used by the demo to prove the kernel compiles
    and runs on TPU, and as the skeleton for subclass forwards).
    """
    if not force_pallas:
        return x
    return _pallas_identity_copy(x, alias_input=alias_input)


def init_weights_normal(key: jax.Array, shape, gain: float = 0.02) -> jax.Array:
    """JAX analogue of BaseNetwork.init_weights('normal', 0.02) for one
    Conv/Linear weight tensor of the given shape (subclasses would use this)."""
    # TODO(synk): 'xavier' / 'kaiming' / 'orthogonal' init variants are not
    # reproduced here; they are host-side initializers with no kernel content.
    return gain * jax.random.normal(key, shape, dtype=jnp.float32)


if __name__ == "__main__":
    key = jax.random.PRNGKey(0)

    # Module-consistent small NCHW input.
    x = jax.random.normal(key, (2, 4, 16, 16), dtype=jnp.float32)

    # Deterministic weight init for a 3x3 conv a subclass might own (parity
    # with init_weights('normal', 0.02); unused by the base forward).
    _ = init_weights_normal(jax.random.fold_in(key, 1), (4, 4, 3, 3))

    # 1) Default forward: zero-data-movement identity (highest-value path).
    y_fast = base_network_forward(x)
    assert y_fast.shape == x.shape and y_fast.dtype == x.dtype
    assert bool(jnp.allclose(y_fast, x))

    # 2) Pallas tiled copy kernel on the small input (flattened to (2, 1024)).
    y_small = jax.block_until_ready(base_network_forward(x, force_pallas=True))
    assert y_small.shape == x.shape and y_small.dtype == x.dtype
    assert bool(jnp.allclose(y_small, x)), "identity pass-through mismatch (small)"

    # 3) Multi-step pipelined grid with a masked partial tail (1000 rows is not
    #    a multiple of the chosen block rows), plus input->output aliasing via
    #    jit donation so no second HBM buffer is allocated.
    key2 = jax.random.fold_in(key, 2)
    x_large = jax.random.normal(key2, (1000, 1024), dtype=jnp.float32)
    donating_fwd = jax.jit(
        functools.partial(base_network_forward, force_pallas=True, alias_input=True),
        donate_argnums=(0,),
    )
    y_large = jax.block_until_ready(donating_fwd(x_large))
    # x_large's buffer was donated — regenerate the reference deterministically.
    x_large_ref = jax.random.normal(key2, (1000, 1024), dtype=jnp.float32)
    assert y_large.shape == (1000, 1024) and y_large.dtype == jnp.float32
    assert bool(jnp.allclose(y_large, x_large_ref)), "identity mismatch (large/donated)"

    # 4) Fallback path: element count not divisible by 128 — whole trailing
    #    dim, row-tiled blocks keep VMEM bounded and the pipeline alive.
    x_odd = jax.random.normal(jax.random.fold_in(key, 3), (2, 4, 3, 5), jnp.float32)
    y_odd = jax.block_until_ready(base_network_forward(x_odd, force_pallas=True))
    assert y_odd.shape == x_odd.shape and y_odd.dtype == x_odd.dtype
    assert bool(jnp.allclose(y_odd, x_odd)), "identity mismatch (fallback)"

    print("KERNEL_OK")
</pallas_src>

<mosaic_0001>
module attributes {stable_mosaic.version = 11 : i64} {
  func.func @_passthrough_copy_kernel(%arg0: i32, %arg1: memref<2x1024xf32, #tpu.memory_space<vmem>>, %arg2: memref<2x1024xf32, #tpu.memory_space<vmem>>) attributes {dimension_semantics = [#tpu.dimension_semantics<parallel>], iteration_bounds = array<i64: 1>, scalar_prefetch = 0 : i64, scratch_operands = 0 : i64, tpu.core_type = #tpu.core_type<tc>, window_params = [{transform_indices = @transform_0, window_bounds = array<i64: 2, 1024>}, {transform_indices = @transform_1, window_bounds = array<i64: 2, 1024>}]} {
    %c0 = arith.constant 0 : index
    %c0_0 = arith.constant 0 : index
    %0 = vector.load %arg1[%c0, %c0_0] : memref<2x1024xf32, #tpu.memory_space<vmem>>, vector<2x1024xf32>
    %c0_1 = arith.constant 0 : index
    %c0_2 = arith.constant 0 : index
    %1 = vector.load %arg2[%c0_1, %c0_2] : memref<2x1024xf32, #tpu.memory_space<vmem>>, vector<2x1024xf32>
    tpu.vector_store %arg2[%c0_1, %c0_2], %0 {strides = array<i32>} : memref<2x1024xf32, #tpu.memory_space<vmem>>, vector<2x1024xf32>,
    return
  }
  func.func @transform_0(%arg0: i32) -> (i32, i32) {
    %c0_i32 = arith.constant 0 : i32
    %c0_i32_0 = arith.constant 0 : i32
    return %arg0, %c0_i32 : i32, i32
  }
  func.func @transform_1(%arg0: i32) -> (i32, i32) {
    %c0_i32 = arith.constant 0 : i32
    %c0_i32_0 = arith.constant 0 : i32
    return %arg0, %c0_i32 : i32, i32
  }
}

</mosaic_0001>

<bundles_post_ra>
// kernel: tpu_custom_call.1
= control target key start
LH: loop header
LB: loop body
LE: loop exit
PB: predicated region body
PF: predicated region fallthrough
CT: control target
= control target key end

     0   :  { %6 = vsyncpa [#allocation3], 0  ;;  %s126_s0 = inlined_call_operand.hbm [shape: f32[2,1024], index: 0, kind: input, shape index: {}]   ;;  %s127_s1 = inlined_call_operand.hbm [shape: f32[2,1024], index: 1, kind: output, shape index: {}]  }
   0x1   :  { %7 = vsyncpa [#allocation4], 0  ;;  %s90_s6 = smov [#allocation2]   ;;  %s42_s10 = scalar_lea.hbm %s126_s0, 256 }
   0x2   :  { %s14_s7 = sshll.u32 %s90_s6, 4  ;;  %p43_p0 = scmp.ne.s32.totalorder %s126_s0, %s42_s10  ;;  %s15_s7 = int_to_ptr.vmem [resolvable:$true] %s14_s7 }
   0x3   :  { %p46_p1 = scmp.lt.u32.totalorder %s42_s10, %s126_s0 }
   0x5   :  { %p48_p2 = pnand %p46_p1, %p43_p0 }
   0x7   :  { %51 = shalt.err (!%p48_p2)
}
   0x8   :  { %s52_s15 = scalar_lea.vmem %s15_s7, 256  ;;  %p57_p4 = scmp.lt.s32.totalorder %s15_s7, %s15_s7 }
   0x9   :  { %p53_p3 = scmp.ne.s32.totalorder %s15_s7, %s52_s15  ;;  %p58_p5 = scmp.lt.s32.totalorder %s52_s15, %s52_s15 }
   0xb   :  { %p59_p6 = por %p58_p5, %p57_p4 }
   0xd   :  { %p60_p7 = pnand %p59_p6, %p53_p3 }
   0xf   :  { %63 = shalt.err (!%p60_p7)
}
  0x10   :  { %17 = dma.hbm_to_vmem [thread:$0]  %s126_s0, 256, %s15_s7, [#allocation3]  }
  0x11   :  { %86 = dma.done.wait [#allocation3], 256  }
  0x12   :  { %87 = vsyncadd [#allocation3], 4294967040  ;;  %s91_s18 = smov [#allocation5]   ;;  %v21_v0 = vld [vmem:[#allocation2] sm:$0xff]  ;;  %v22_v1 = vld [vmem:[#allocation2 + $0x8] sm:$0xff] }
  0x13   :  { %s31_s19 = sshll.u32 %s91_s18, 4  ;;  %23 = vst [vmem:[#allocation5] sm:$0xff] %v21_v0  ;;  %24 = vst [vmem:[#allocation5 + $0x8] sm:$0xff] %v22_v1  ;;  %s32_s19 = int_to_ptr.vmem [resolvable:$true] %s31_s19 }
  0x14   :  { %s64_s20 = scalar_lea.vmem %s32_s19, 256  ;;  %p69_p9 = scmp.lt.s32.totalorder %s32_s19, %s32_s19 }
  0x15   :  { %p65_p8 = scmp.ne.s32.totalorder %s32_s19, %s64_s20  ;;  %p70_p10 = scmp.lt.s32.totalorder %s64_s20, %s64_s20 }
  0x17   :  { %p71_p11 = por %p70_p10, %p69_p9 }
  0x19   :  { %p72_p12 = pnand %p71_p11, %p65_p8 }
  0x1b   :  { %75 = shalt.err (!%p72_p12)
}
  0x1c   :  { %s76_s0 = scalar_lea.hbm %s127_s1, 256 }
  0x1d   :  { %p77_p13 = scmp.ne.s32.totalorder %s127_s1, %s76_s0  ;;  %p80_p0 = scmp.lt.u32.totalorder %s76_s0, %s127_s1 }
  0x1f   :  { %p82_p1 = pnand %p80_p0, %p77_p13 }
  0x21   :  { %85 = shalt.err (!%p82_p1)
}
  0x22   :  { %34 = dma.vmem_to_hbm [thread:$0]  %s32_s19, 256, %s127_s1, [#allocation4]  }
  0x23   :  { %88 = dma.done.wait [#allocation4], 256  }
  0x24   :  { %89 = vsyncadd [#allocation4], 4294967040 }
  0x25   :  { %38 = vsyncpa [#allocation3], 1 }
  0x26   :  { %39 = vsyncpa [#allocation4], 1 }

</bundles_post_ra>
